<compile_context>
chip_gen: v7x
topology: tpu7x:2x2x1
jax: 0.10.0
libtpu: 0.0.40
codegen_flags: <defaults>
</compile_context>

<pallas_src>
import functools

import jax
import jax.numpy as jnp
import numpy as np
from jax import lax
from jax.experimental import pallas as pl
from jax.experimental.pallas import tpu as pltpu


# ----------------------------------------------------------------------------
# Fused kernel body
#   layout: attention dim A / channels C on sublanes, pixels (B*HW) on lanes.
#   inputs : hidden (B,HID), patches (128, B*HW), cnn (C, B*HW),
#            alpha_sum (1, B*HW), [mask (1, B*HW)],
#            Wh (A,HID), bh (A,1), Wcov (A,128), Wenc (A,C), benc (A,1),
#            wal (1,A), bal (1,1)
#   outputs: context (B,C), alpha (1, B*HW), alpha_sum_out (1, B*HW)
# ----------------------------------------------------------------------------
def _attention_body(hid_ref, pat_ref, cnn_ref, asum_ref, mask_ref,
                    wh_ref, bh_ref, wcov_ref, wenc_ref, benc_ref,
                    wal_ref, bal_ref,
                    ctx_ref, alpha_ref, asum_out_ref, *, B, HW):
    N = B * HW

    # ---- batched query: (A, B) = Wh . hidden^T + bh -----------------------
    q = lax.dot_general(
        wh_ref[...], hid_ref[...],
        dimension_numbers=(((1,), (1,)), ((), ())),
        preferred_element_type=jnp.float32) + bh_ref[...]          # (A, B)

    # ---- coverage + encoder contractions, batched over all B*HW lanes -----
    cov = jnp.dot(wcov_ref[...], pat_ref[...],
                  preferred_element_type=jnp.float32)              # (A, N)
    cnt = jnp.dot(wenc_ref[...], cnn_ref[...],
                  preferred_element_type=jnp.float32)              # (A, N)
    pre = cov + cnt + benc_ref[...]                                # (A, N)

    # ---- per-batch lane-segment masks (comparisons only) ------------------
    pos = lax.broadcasted_iota(jnp.int32, (1, N), 1)               # (1, N)
    segmasks = [
        jnp.logical_and(pos >= b * HW, pos < (b + 1) * HW).astype(jnp.float32)
        for b in range(B)
    ]

    # add the per-batch query to its HW segment
    for b in range(B):
        pre = pre + q[:, b:b + 1] * segmasks[b]                    # (A,1)*(1,N)

    score = jnp.tanh(pre)                                          # (A, N) f32
    energy = jnp.dot(wal_ref[...], score,
                     preferred_element_type=jnp.float32) + bal_ref[...]  # (1, N)

    # ---- softmax: global max shift (matches torch .max()), per-batch norm --
    m = jnp.max(energy, axis=1, keepdims=True)                     # (1, 1)
    ex = jnp.exp(energy - m)
    if mask_ref is not None:
        ex = ex * mask_ref[...]

    denom = jnp.zeros_like(energy)
    for b in range(B):
        d_b = jnp.sum(ex[:, b * HW:(b + 1) * HW], axis=1, keepdims=True)  # (1,1)
        denom = denom + d_b * segmasks[b]
    alpha = ex * pl.reciprocal(denom + 1e-10, approx=True)         # (1, N)

    # lane-dense slab stores
    alpha_ref[...] = alpha
    asum_out_ref[...] = alpha + asum_ref[...]

    # ---- context: per-batch alpha(1,HW) . cnn(C,HW)^T (in-register alpha) --
    for b in range(B):
        a_b = alpha[:, b * HW:(b + 1) * HW]                        # (1, HW)
        c_b = cnn_ref[:, b * HW:(b + 1) * HW].astype(jnp.float32)  # (C, HW)
        ctx_ref[b:b + 1, :] = lax.dot_general(
            a_b, c_b,
            dimension_numbers=(((1,), (1,)), ((), ())),
            preferred_element_type=jnp.float32)                    # (1, C)


def _make_kernel(B, HW, masked):
    if masked:
        def kernel(hid, pat, cnn, asum, mask, wh, bh, wcov, wenc, benc, wal, bal,
                   ctx, alpha, asum_out):
            _attention_body(hid, pat, cnn, asum, mask, wh, bh, wcov, wenc, benc,
                            wal, bal, ctx, alpha, asum_out, B=B, HW=HW)
    else:
        def kernel(hid, pat, cnn, asum, wh, bh, wcov, wenc, benc, wal, bal,
                   ctx, alpha, asum_out):
            _attention_body(hid, pat, cnn, asum, None, wh, bh, wcov, wenc, benc,
                            wal, bal, ctx, alpha, asum_out, B=B, HW=HW)
    return kernel


# ----------------------------------------------------------------------------
# Parameter init (deterministic, PyTorch-shaped weights)
# ----------------------------------------------------------------------------
def init_params(key, channel, hidden, attention_dim):
    ks = jax.random.split(key, 8)
    s = 0.05
    return {
        "hidden_w": jax.random.normal(ks[0], (attention_dim, hidden), jnp.float32) * s,
        "hidden_b": jax.random.normal(ks[1], (attention_dim,), jnp.float32) * s,
        "enc_w":    jax.random.normal(ks[2], (attention_dim, channel, 1, 1), jnp.float32) * s,
        "enc_b":    jax.random.normal(ks[3], (attention_dim,), jnp.float32) * s,
        "conv_w":   jax.random.normal(ks[4], (512, 1, 11, 11), jnp.float32) * s,
        "att_w":    jax.random.normal(ks[5], (attention_dim, 512), jnp.float32) * s,
        "alpha_w":  jax.random.normal(ks[6], (1, attention_dim), jnp.float32) * s,
        "alpha_b":  jax.random.normal(ks[7], (1,), jnp.float32) * s,
    }


# ----------------------------------------------------------------------------
# One-time weight preparation (hoisted out of the per-step wrapper):
#   fuse attention_conv (512,1,11,11) with attention_weight (A,512) into a
#   single (A, 128) matrix (taps zero-padded 121 -> 128 for lane/MXU alignment).
#   `compute_dtype` controls the MXU operand dtype (bf16 on v6e/v7x).
# ----------------------------------------------------------------------------
def prepare_weights(p, compute_dtype=jnp.float32):
    A, _ = p["hidden_w"].shape
    KK, KKP = 121, 128
    wcov = p["att_w"] @ p["conv_w"].reshape(512, KK)          # (A, 121) in f32
    wcov = jnp.pad(wcov, ((0, 0), (0, KKP - KK)))             # (A, 128)
    return {
        "Wh":   p["hidden_w"],                                # (A, HID)  f32
        "bh":   p["hidden_b"].reshape(A, 1),                  # (A, 1)    f32
        "Wcov": wcov.astype(compute_dtype),                   # (A, 128)
        "Wenc": p["enc_w"][:, :, 0, 0].astype(compute_dtype), # (A, C)
        "benc": p["enc_b"].reshape(A, 1),                     # (A, 1)    f32
        "wal":  p["alpha_w"],                                 # (1, A)    f32
        "bal":  p["alpha_b"].reshape(1, 1),                   # (1, 1)    f32
        "compute_dtype": compute_dtype,
    }


# ----------------------------------------------------------------------------
# Forward wrapper: im2col glue + one fused pallas_call
# ----------------------------------------------------------------------------
def attention_forward(w, cnn_features, hidden, alpha_sum, image_mask=None):
    B, C, H, Wd = cnn_features.shape
    HW = H * Wd
    N = B * HW
    K, KK, KKP, PAD = 11, 121, 128, 5
    cdt = w["compute_dtype"]

    # im2col for the 11x11 coverage conv, taps-major & batch-flattened:
    # patches[(ky,kx), b*HW + y*W + x] = alpha_sum_pad[b, y+ky, x+kx]
    # TODO(synk): move this im2col into the kernel to avoid the 121x HBM
    # amplification of alpha_sum at production HW.
    a = jnp.pad(alpha_sum[:, 0], ((0, 0), (PAD, PAD), (PAD, PAD)))
    patches = jnp.stack(
        [a[:, ky:ky + H, kx:kx + Wd].reshape(B, HW)
         for ky in range(K) for kx in range(K)], axis=0)            # (121, B, HW)
    patches = patches.reshape(KK, N)                                # (121, N)
    patches = jnp.pad(patches, ((0, KKP - KK), (0, 0))).astype(cdt) # (128, N)

    # channels on sublanes, batch-flattened pixels on lanes (layout plumbing)
    cnn_flat = jnp.transpose(cnn_features, (1, 0, 2, 3)).reshape(C, N).astype(cdt)
    asum_flat = alpha_sum.reshape(1, N)                             # f32

    weight_args = (w["Wh"], w["bh"], w["Wcov"], w["Wenc"], w["benc"],
                   w["wal"], w["bal"])

    if image_mask is not None:
        mask_flat = image_mask.reshape(1, N).astype(jnp.float32)
        args = (hidden, patches, cnn_flat, asum_flat, mask_flat) + weight_args
        kernel = _make_kernel(B, HW, masked=True)
    else:
        args = (hidden, patches, cnn_flat, asum_flat) + weight_args
        kernel = _make_kernel(B, HW, masked=False)

    vmem = pl.BlockSpec(memory_space=pltpu.MemorySpace.VMEM)
    ctx, alpha, asum_out = pl.pallas_call(
        kernel,
        out_shape=(jax.ShapeDtypeStruct((B, C), jnp.float32),
                   jax.ShapeDtypeStruct((1, N), jnp.float32),
                   jax.ShapeDtypeStruct((1, N), jnp.float32)),
        in_specs=[vmem] * len(args),
        out_specs=(vmem, vmem, vmem),
        compiler_params=pltpu.CompilerParams(
            vmem_limit_bytes=32 * 1024 * 1024),
    )(*args)

    return ctx, alpha.reshape(B, H, Wd), asum_out.reshape(B, 1, H, Wd)


# ----------------------------------------------------------------------------
# Pure-JAX reference (mirrors the PyTorch forward) for a sanity check
# ----------------------------------------------------------------------------
def reference(p, cnn_features, hidden, alpha_sum, image_mask):
    B, C, H, W = cnn_features.shape
    query = hidden @ p["hidden_w"].T + p["hidden_b"]
    a = jnp.pad(alpha_sum[:, 0], ((0, 0), (5, 5), (5, 5)))
    patches = jnp.stack(
        [a[:, ky:ky + H, kx:kx + W] for ky in range(11) for kx in range(11)],
        axis=-1)                                                   # (B,H,W,121)
    alpha_sum_trans = jnp.einsum("bhwk,ck->bhwc", patches, p["conv_w"].reshape(512, 121))
    coverage = alpha_sum_trans @ p["att_w"].T
    cnn_trans = jnp.einsum("bchw,ac->bhwa", cnn_features, p["enc_w"][:, :, 0, 0]) + p["enc_b"]
    score = jnp.tanh(query[:, None, None, :] + coverage + cnn_trans)
    energy = score @ p["alpha_w"].T + p["alpha_b"]
    energy = energy - energy.max()
    energy_exp = jnp.exp(energy[..., 0])
    if image_mask is not None:
        energy_exp = energy_exp * image_mask[:, 0]
    alpha = energy_exp / (energy_exp.sum((-1, -2))[:, None, None] + 1e-10)
    asum_out = alpha[:, None] + alpha_sum
    ctx = (alpha[:, None] * cnn_features).sum((-1, -2))
    return ctx, alpha, asum_out


if __name__ == "__main__":
    B, C, H, W = 2, 4, 16, 16        # encoder out_channels = 4
    HID, A = 32, 32                  # decoder hidden_size = 32, attention_dim = 32

    key = jax.random.PRNGKey(0)
    k_in, k_par = jax.random.split(key)
    k0, k1, k2 = jax.random.split(k_in, 3)

    cnn_features = jax.random.normal(k0, (B, C, H, W), jnp.float32)
    hidden = jax.random.normal(k1, (B, HID), jnp.float32)
    alpha_sum = jax.random.uniform(k2, (B, 1, H, W), jnp.float32)
    image_mask = jnp.ones((B, 1, H, W), jnp.float32)

    params = init_params(k_par, C, HID, A)
    ctx_r, alpha_r, asum_r = reference(params, cnn_features, hidden,
                                       alpha_sum, image_mask)
    ctx_r2, alpha_r2, asum_r2 = reference(params, cnn_features, hidden,
                                          alpha_sum, None)

    # ---- f32 path (tight numerical check against the f32 reference) -------
    weights = prepare_weights(params, compute_dtype=jnp.float32)   # once per model load

    ctx, alpha, asum_out = attention_forward(weights, cnn_features, hidden,
                                             alpha_sum, image_mask)
    jax.block_until_ready((ctx, alpha, asum_out))
    np.testing.assert_allclose(np.asarray(ctx), np.asarray(ctx_r), rtol=1e-3, atol=1e-3)
    np.testing.assert_allclose(np.asarray(alpha), np.asarray(alpha_r), rtol=1e-3, atol=1e-3)
    np.testing.assert_allclose(np.asarray(asum_out), np.asarray(asum_r), rtol=1e-3, atol=1e-3)

    # mask=None path (no ones-mask materialized)
    ctx2, alpha2, asum2 = attention_forward(weights, cnn_features, hidden,
                                            alpha_sum, None)
    jax.block_until_ready((ctx2, alpha2, asum2))
    np.testing.assert_allclose(np.asarray(ctx2), np.asarray(ctx_r2), rtol=1e-3, atol=1e-3)
    np.testing.assert_allclose(np.asarray(alpha2), np.asarray(alpha_r2), rtol=1e-3, atol=1e-3)
    np.testing.assert_allclose(np.asarray(asum2), np.asarray(asum_r2), rtol=1e-3, atol=1e-3)

    # ---- bf16 MXU-operand path (v6e/v7x lever), looser tolerance -----------
    weights_bf16 = prepare_weights(params, compute_dtype=jnp.bfloat16)
    ctx3, alpha3, asum3 = attention_forward(weights_bf16, cnn_features, hidden,
                                            alpha_sum, image_mask)
    jax.block_until_ready((ctx3, alpha3, asum3))
    np.testing.assert_allclose(np.asarray(ctx3), np.asarray(ctx_r), rtol=5e-2, atol=2e-2)
    np.testing.assert_allclose(np.asarray(alpha3), np.asarray(alpha_r), rtol=5e-2, atol=2e-2)
    np.testing.assert_allclose(np.asarray(asum3), np.asarray(asum_r), rtol=5e-2, atol=2e-2)

    print("KERNEL_OK")
</pallas_src>

<mosaic_0001>
module attributes {stable_mosaic.version = 11 : i64} {
  func.func @kernel(%arg0: memref<2x32xf32, #tpu.memory_space<vmem>>, %arg1: memref<128x512xf32, #tpu.memory_space<vmem>>, %arg2: memref<4x512xf32, #tpu.memory_space<vmem>>, %arg3: memref<1x512xf32, #tpu.memory_space<vmem>>, %arg4: memref<1x512xf32, #tpu.memory_space<vmem>>, %arg5: memref<32x32xf32, #tpu.memory_space<vmem>>, %arg6: memref<32x1xf32, #tpu.memory_space<vmem>>, %arg7: memref<32x128xf32, #tpu.memory_space<vmem>>, %arg8: memref<32x4xf32, #tpu.memory_space<vmem>>, %arg9: memref<32x1xf32, #tpu.memory_space<vmem>>, %arg10: memref<1x32xf32, #tpu.memory_space<vmem>>, %arg11: memref<1x1xf32, #tpu.memory_space<vmem>>, %arg12: memref<2x4xf32, #tpu.memory_space<vmem>>, %arg13: memref<1x512xf32, #tpu.memory_space<vmem>>, %arg14: memref<1x512xf32, #tpu.memory_space<vmem>>) attributes {dimension_semantics = [], scalar_prefetch = 0 : i64, scratch_operands = 0 : i64, tpu.core_type = #tpu.core_type<tc>} {
    %c0 = arith.constant 0 : index
    %c0_0 = arith.constant 0 : index
    %0 = vector.load %arg5[%c0, %c0_0] : memref<32x32xf32, #tpu.memory_space<vmem>>, vector<32x32xf32>
    %c0_1 = arith.constant 0 : index
    %c0_2 = arith.constant 0 : index
    %1 = vector.load %arg0[%c0_1, %c0_2] : memref<2x32xf32, #tpu.memory_space<vmem>>, vector<2x32xf32>
    %cst = arith.constant dense<0.000000e+00> : vector<32x2xf32>
    %2 = tpu.matmul %0, %1, %cst {dimension_numbers = #tpu.dot_dimension_numbers<[1], [1], [0], [0], [0, 0, 1, 0], [], []>} : vector<32x32xf32>, vector<2x32xf32>, vector<32x2xf32> -> vector<32x2xf32>
    %c0_3 = arith.constant 0 : index
    %c0_4 = arith.constant 0 : index
    %3 = vector.load %arg6[%c0_3, %c0_4] : memref<32x1xf32, #tpu.memory_space<vmem>>, vector<32x1xf32>
    %4 = vector.broadcast %3 : vector<32x1xf32> to vector<32x2xf32>
    %5 = arith.addf %2, %4 : vector<32x2xf32>
    %c0_5 = arith.constant 0 : index
    %c0_6 = arith.constant 0 : index
    %6 = vector.load %arg7[%c0_5, %c0_6] : memref<32x128xf32, #tpu.memory_space<vmem>>, vector<32x128xf32>
    %c0_7 = arith.constant 0 : index
    %c0_8 = arith.constant 0 : index
    %7 = vector.load %arg1[%c0_7, %c0_8] : memref<128x512xf32, #tpu.memory_space<vmem>>, vector<128x512xf32>
    %cst_9 = arith.constant dense<0.000000e+00> : vector<32x512xf32>
    %8 = tpu.matmul %6, %7, %cst_9 {dimension_numbers = #tpu.dot_dimension_numbers<[1], [0], [0], [1], [0, 0, 1, 1], [], []>} : vector<32x128xf32>, vector<128x512xf32>, vector<32x512xf32> -> vector<32x512xf32>
    %c0_10 = arith.constant 0 : index
    %c0_11 = arith.constant 0 : index
    %9 = vector.load %arg8[%c0_10, %c0_11] : memref<32x4xf32, #tpu.memory_space<vmem>>, vector<32x4xf32>
    %c0_12 = arith.constant 0 : index
    %c0_13 = arith.constant 0 : index
    %10 = vector.load %arg2[%c0_12, %c0_13] : memref<4x512xf32, #tpu.memory_space<vmem>>, vector<4x512xf32>
    %cst_14 = arith.constant dense<0.000000e+00> : vector<32x512xf32>
    %11 = tpu.matmul %9, %10, %cst_14 {dimension_numbers = #tpu.dot_dimension_numbers<[1], [0], [0], [1], [0, 0, 1, 1], [], []>} : vector<32x4xf32>, vector<4x512xf32>, vector<32x512xf32> -> vector<32x512xf32>
    %12 = arith.addf %8, %11 : vector<32x512xf32>
    %c0_15 = arith.constant 0 : index
    %c0_16 = arith.constant 0 : index
    %13 = vector.load %arg9[%c0_15, %c0_16] : memref<32x1xf32, #tpu.memory_space<vmem>>, vector<32x1xf32>
    %14 = vector.broadcast %13 : vector<32x1xf32> to vector<32x512xf32>
    %15 = arith.addf %12, %14 : vector<32x512xf32>
    %16 = tpu.iota {dimensions = array<i32: 1>} : vector<1x512xi32>
    %c0_i32 = arith.constant 0 : i32
    %17 = vector.broadcast %c0_i32 : i32 to vector<1x512xi32>
    %18 = arith.cmpi sge, %16, %17 : vector<1x512xi32>
    %c256_i32 = arith.constant 256 : i32
    %19 = vector.broadcast %c256_i32 : i32 to vector<1x512xi32>
    %20 = arith.cmpi slt, %16, %19 : vector<1x512xi32>
    %21 = arith.andi %18, %20 : vector<1x512xi1>
    %22 = arith.extui %21 : vector<1x512xi1> to vector<1x512xi32>
    %23 = arith.sitofp %22 : vector<1x512xi32> to vector<1x512xf32>
    %c256_i32_17 = arith.constant 256 : i32
    %24 = vector.broadcast %c256_i32_17 : i32 to vector<1x512xi32>
    %25 = arith.cmpi sge, %16, %24 : vector<1x512xi32>
    %c512_i32 = arith.constant 512 : i32
    %26 = vector.broadcast %c512_i32 : i32 to vector<1x512xi32>
    %27 = arith.cmpi slt, %16, %26 : vector<1x512xi32>
    %28 = arith.andi %25, %27 : vector<1x512xi1>
    %29 = arith.extui %28 : vector<1x512xi1> to vector<1x512xi32>
    %30 = arith.sitofp %29 : vector<1x512xi32> to vector<1x512xf32>
    %31 = vector.extract_strided_slice %5 {offsets = [0, 0], sizes = [32, 1], strides = [1, 1]} : vector<32x2xf32> to vector<32x1xf32>
    %32 = vector.broadcast %31 : vector<32x1xf32> to vector<32x512xf32>
    %33 = vector.broadcast %23 : vector<1x512xf32> to vector<32x512xf32>
    %34 = arith.mulf %32, %33 : vector<32x512xf32>
    %35 = arith.addf %15, %34 : vector<32x512xf32>
    %36 = vector.extract_strided_slice %5 {offsets = [0, 1], sizes = [32, 1], strides = [1, 1]} : vector<32x2xf32> to vector<32x1xf32>
    %37 = vector.broadcast %36 : vector<32x1xf32> to vector<32x512xf32>
    %38 = vector.broadcast %30 : vector<1x512xf32> to vector<32x512xf32>
    %39 = arith.mulf %37, %38 : vector<32x512xf32>
    %40 = arith.addf %35, %39 : vector<32x512xf32>
    %41 = math.tanh %40 : vector<32x512xf32>
    %c0_18 = arith.constant 0 : index
    %c0_19 = arith.constant 0 : index
    %42 = vector.load %arg10[%c0_18, %c0_19] : memref<1x32xf32, #tpu.memory_space<vmem>>, vector<1x32xf32>
    %cst_20 = arith.constant dense<0.000000e+00> : vector<1x512xf32>
    %43 = tpu.matmul %42, %41, %cst_20 {dimension_numbers = #tpu.dot_dimension_numbers<[1], [0], [0], [1], [0, 0, 1, 1], [], []>} : vector<1x32xf32>, vector<32x512xf32>, vector<1x512xf32> -> vector<1x512xf32>
    %c0_21 = arith.constant 0 : index
    %c0_22 = arith.constant 0 : index
    %44 = vector.load %arg11[%c0_21, %c0_22] : memref<1x1xf32, #tpu.memory_space<vmem>>, vector<1x1xf32>
    %45 = vector.broadcast %44 : vector<1x1xf32> to vector<1x512xf32>
    %46 = arith.addf %43, %45 : vector<1x512xf32>
    %cst_23 = arith.constant dense<0xFF800000> : vector<1xf32>
    %47 = vector.multi_reduction <maximumf>, %46, %cst_23 [1] : vector<1x512xf32> to vector<1xf32>
    %48 = vector.shape_cast %47 : vector<1xf32> to vector<1x1xf32>
    %49 = vector.broadcast %48 : vector<1x1xf32> to vector<1x512xf32>
    %50 = arith.subf %46, %49 : vector<1x512xf32>
    %51 = math.exp %50 : vector<1x512xf32>
    %c0_24 = arith.constant 0 : index
    %c0_25 = arith.constant 0 : index
    %52 = vector.load %arg4[%c0_24, %c0_25] : memref<1x512xf32, #tpu.memory_space<vmem>>, vector<1x512xf32>
    %53 = arith.mulf %51, %52 : vector<1x512xf32>
    %cst_26 = arith.constant 0.000000e+00 : f32
    %54 = vector.broadcast %cst_26 : f32 to vector<1x512xf32>
    %55 = vector.extract_strided_slice %53 {offsets = [0, 0], sizes = [1, 256], strides = [1, 1]} : vector<1x512xf32> to vector<1x256xf32>
    %cst_27 = arith.constant dense<0.000000e+00> : vector<1xf32>
    %56 = vector.multi_reduction <add>, %55, %cst_27 [1] : vector<1x256xf32> to vector<1xf32>
    %57 = vector.shape_cast %56 : vector<1xf32> to vector<1x1xf32>
    %58 = vector.broadcast %57 : vector<1x1xf32> to vector<1x512xf32>
    %59 = arith.mulf %58, %23 : vector<1x512xf32>
    %60 = arith.addf %54, %59 : vector<1x512xf32>
    %61 = vector.extract_strided_slice %53 {offsets = [0, 256], sizes = [1, 256], strides = [1, 1]} : vector<1x512xf32> to vector<1x256xf32>
    %cst_28 = arith.constant dense<0.000000e+00> : vector<1xf32>
    %62 = vector.multi_reduction <add>, %61, %cst_28 [1] : vector<1x256xf32> to vector<1xf32>
    %63 = vector.shape_cast %62 : vector<1xf32> to vector<1x1xf32>
    %64 = vector.broadcast %63 : vector<1x1xf32> to vector<1x512xf32>
    %65 = arith.mulf %64, %30 : vector<1x512xf32>
    %66 = arith.addf %60, %65 : vector<1x512xf32>
    %cst_29 = arith.constant 1.000000e-10 : f32
    %67 = vector.broadcast %cst_29 : f32 to vector<1x512xf32>
    %68 = arith.addf %66, %67 : vector<1x512xf32>
    %69 = tpu.reciprocal %68 {approx = true} : vector<1x512xf32> -> vector<1x512xf32>
    %70 = arith.mulf %53, %69 : vector<1x512xf32>
    %c0_30 = arith.constant 0 : index
    %c0_31 = arith.constant 0 : index
    %71 = vector.load %arg13[%c0_30, %c0_31] : memref<1x512xf32, #tpu.memory_space<vmem>>, vector<1x512xf32>
    tpu.vector_store %arg13[%c0_30, %c0_31], %70 {strides = array<i32>} : memref<1x512xf32, #tpu.memory_space<vmem>>, vector<1x512xf32>,
    %c0_32 = arith.constant 0 : index
    %c0_33 = arith.constant 0 : index
    %72 = vector.load %arg3[%c0_32, %c0_33] : memref<1x512xf32, #tpu.memory_space<vmem>>, vector<1x512xf32>
    %73 = arith.addf %70, %72 : vector<1x512xf32>
    %c0_34 = arith.constant 0 : index
    %c0_35 = arith.constant 0 : index
    %74 = vector.load %arg14[%c0_34, %c0_35] : memref<1x512xf32, #tpu.memory_space<vmem>>, vector<1x512xf32>
    tpu.vector_store %arg14[%c0_34, %c0_35], %73 {strides = array<i32>} : memref<1x512xf32, #tpu.memory_space<vmem>>, vector<1x512xf32>,
    %75 = vector.extract_strided_slice %70 {offsets = [0, 0], sizes = [1, 256], strides = [1, 1]} : vector<1x512xf32> to vector<1x256xf32>
    %c0_36 = arith.constant 0 : index
    %c0_37 = arith.constant 0 : index
    %76 = vector.load %arg2[%c0_36, %c0_37] : memref<4x512xf32, #tpu.memory_space<vmem>>, vector<4x256xf32>
    %cst_38 = arith.constant dense<0.000000e+00> : vector<1x4xf32>
    %77 = tpu.matmul %75, %76, %cst_38 {dimension_numbers = #tpu.dot_dimension_numbers<[1], [1], [0], [0], [0, 0, 1, 0], [], []>} : vector<1x256xf32>, vector<4x256xf32>, vector<1x4xf32> -> vector<1x4xf32>
    %c0_39 = arith.constant 0 : index
    %c0_40 = arith.constant 0 : index
    %78 = vector.load %arg12[%c0_39, %c0_40] : memref<2x4xf32, #tpu.memory_space<vmem>>, vector<1x4xf32>
    tpu.vector_store %arg12[%c0_39, %c0_40], %77 {strides = array<i32>} : memref<2x4xf32, #tpu.memory_space<vmem>>, vector<1x4xf32>,
    %79 = vector.extract_strided_slice %70 {offsets = [0, 256], sizes = [1, 256], strides = [1, 1]} : vector<1x512xf32> to vector<1x256xf32>
    %c0_41 = arith.constant 0 : index
    %c256 = arith.constant 256 : index
    %80 = vector.load %arg2[%c0_41, %c256] : memref<4x512xf32, #tpu.memory_space<vmem>>, vector<4x256xf32>
    %cst_42 = arith.constant dense<0.000000e+00> : vector<1x4xf32>
    %81 = tpu.matmul %79, %80, %cst_42 {dimension_numbers = #tpu.dot_dimension_numbers<[1], [1], [0], [0], [0, 0, 1, 0], [], []>} : vector<1x256xf32>, vector<4x256xf32>, vector<1x4xf32> -> vector<1x4xf32>
    %c1 = arith.constant 1 : index
    %c0_43 = arith.constant 0 : index
    %82 = vector.load %arg12[%c1, %c0_43] : memref<2x4xf32, #tpu.memory_space<vmem>>, vector<1x4xf32>
    tpu.vector_store %arg12[%c1, %c0_43], %81 {strides = array<i32>} : memref<2x4xf32, #tpu.memory_space<vmem>>, vector<1x4xf32>,
    return
  }
}

</mosaic_0001>

<bundles_post_ra>
// kernel: tpu_custom_call.1
= control target key start
LH: loop header
LB: loop body
LE: loop exit
PB: predicated region body
PF: predicated region fallthrough
CT: control target
= control target key end

     0   :  { %s1968_s0 = inlined_call_operand.vmem [shape: f32[2,32], index: 0, kind: input, shape index: {}]   ;;  %s1969_s1 = inlined_call_operand.hbm [shape: f32[128,512], index: 1, kind: input, shape index: {}]   ;;  %s1970_s2 = inlined_call_operand.vmem [shape: f32[4,512], index: 2, kind: input, shape index: {}]   ;;  %s1971_s3 = inlined_call_operand.vmem [shape: f32[1,512], index: 3, kind: input, shape index: {}]   ;;  %s1972_s4 = inlined_call_operand.vmem [shape: f32[1,512], index: 4, kind: input, shape index: {}]   ;;  %s1973_s5 = inlined_call_operand.vmem [shape: f32[32,32], index: 5, kind: input, shape index: {}]   ;;  %s1974_s6 = inlined_call_operand.vmem [shape: f32[32,1], index: 6, kind: input, shape index: {}]   ;;  %s1975_s7 = inlined_call_operand.vmem [shape: f32[32,128], index: 7, kind: input, shape index: {}]   ;;  %s1976_s8 = inlined_call_operand.vmem [shape: f32[32,4], index: 8, kind: input, shape index: {}]   ;;  %s1977_s9 = inlined_call_operand.vmem [shape: f32[32,1], index: 9, kind: input, shape index: {}]   ;;  %s1978_s10 = inlined_call_operand.vmem [shape: f32[1,32], index: 10, kind: input, shape index: {}]   ;;  %s1979_s11 = inlined_call_operand.<no memory space> [shape: f32[1,1], index: 11, kind: input, shape index: {}]   ;;  %s1980_s12 = inlined_call_operand.hbm [shape: f32[2,4], index: 12, kind: output, shape index: {0}]   ;;  %s1981_s13 = inlined_call_operand.hbm [shape: f32[1,512], index: 13, kind: output, shape index: {1}]   ;;  %s1982_s14 = inlined_call_operand.hbm [shape: f32[1,512], index: 14, kind: output, shape index: {2}]  }
   0x1   :  { %v20_v0 = vstv %s1979_s11 }
   0x2   :  { %21 = vst [vmem:[#allocation2] sm:$0x1] %v20_v0 }
   0x3   :  { %22 = vsyncpa [#allocation4], 0 }
   0x4   :  { %23 = vsyncpa [#allocation5], 0 }
   0x5   :  { %24 = vsyncpa [#allocation8], 0  ;;  %s1660_s15 = smov [#allocation3]   ;;  %s1566_s19 = scalar_lea.hbm %s1969_s1, 8192 }
   0x6   :  { %s32_s16 = sshll.u32 %s1660_s15, 4  ;;  %p1567_p0 = scmp.ne.s32.totalorder %s1969_s1, %s1566_s19  ;;  %s33_s16 = int_to_ptr.vmem [resolvable:$true] %s32_s16 }
   0x7   :  { %p1570_p1 = scmp.lt.u32.totalorder %s1566_s19, %s1969_s1 }
   0x9   :  { %p1572_p2 = pnand %p1570_p1, %p1567_p0 }
   0xb   :  { %1575 = shalt.err (!%p1572_p2)
}
   0xc   :  { %s1576_s11 = scalar_lea.vmem %s33_s16, 8192  ;;  %p1581_p4 = scmp.lt.s32.totalorder %s33_s16, %s33_s16 }
   0xd   :  { %p1577_p3 = scmp.ne.s32.totalorder %s33_s16, %s1576_s11  ;;  %p1582_p5 = scmp.lt.s32.totalorder %s1576_s11, %s1576_s11 }
   0xf   :  { %p1583_p6 = por %p1582_p5, %p1581_p4 }
  0x11   :  { %p1584_p7 = pnand %p1583_p6, %p1577_p3 }
  0x13   :  { %1587 = shalt.err (!%p1584_p7)
}
  0x14   :  { %s1661_s24 = smov 512   ;;  %s1662_s25 = smov 32  }
  0x15   :  { %38 = dma.hbm_to_vmem [thread:$0]  %s1969_s1, 8192, %s33_s16, [#allocation4], %s1661_s24, %s1661_s24, %s1662_s25  }
  0x16   :  { %1654 = dma.done.wait [#allocation4], 8192  }
  0x17   :  { %1655 = vsyncadd [#allocation4], 4294959104  ;;  %v1663_v1 = vmov 0.0   ;;  %v1664_v2 = vmov 0   ;;  %vm91_vm0 = vcmask 261120   ;;  %v1769_v4 = vld [vmem:[%s1970_s2] sm:$0xff] }
  0x18   :  { %356 = vmatprep.mubr.f32.mxu1 %v1663_v1  ;;  %1512 = vset.pattern.permute.xlu0 %v1664_v2  ;;  %v66_v3 = vld [vmem:[%s1968_s0] sm:$0x3]  ;;  %vm283_vm1 = vcmask 1043456   ;;  %v1777_v6 = vcombine.high %v1769_v4, %v1769_v4  ;;  %v197_v7 = vld [vmem:[#allocation3 + $0x8] sm:$0xff]  ;;  %vm270_vm2 = vcmask 31744   ;;  %v65_v25 = vld [vmem:[%s1973_s5 + $0x18] sm:$0xff] }
  0x19   :  { %1513 = vset.pattern.permute.xlu1 %v1664_v2  ;;  %v62_v5 = vld [vmem:[%s1973_s5] sm:$0xff]  ;;  %1398 = vmatprep.subr.msk.mxu0 %vm91_vm0, %v66_v3  ;;  %v201_v8 = vld [vmem:[#allocation3 + $0x28] sm:$0xff]  ;;  %v198_v30 = vld [vmem:[#allocation3 + $0x10] sm:$0xff]  ;;  %vm1005_vm3 = vcmask 1040384  }
  0x1a   :  { %1400 = vmatprep.mubr.msk.f32.mxu0 %vm91_vm0, %v62_v5  ;;  %1399 = vmatpush3.xpose.msk.msra.mxu0 %vm91_vm0, %v66_v3  ;;  %v63_v9 = vld [vmem:[%s1973_s5 + $0x8] sm:$0xff]  ;;  %v1406_v10 = vpack.c.bf16 %v201_v8, %v197_v7  ;;  %v260_v13 = vld [vmem:[%s1976_s8] sm:$0xff]  ;;  %v64_v15 = vld [vmem:[%s1973_s5 + $0x10] sm:$0xff] }
  0x1b   :  { %v196_v11 = vld [vmem:[#allocation3] sm:$0xff]  ;;  %1379 = vmatprep.subr.msk.mxu1 %vm283_vm1, %v1777_v6  ;;  %v205_v16 = vld [vmem:[#allocation3 + $0x48] sm:$0xff]  ;;  %v199_v23 = vld [vmem:[#allocation3 + $0x18] sm:$0xff] }
  0x1c   :  { %v200_v12 = vld [vmem:[#allocation3 + $0x20] sm:$0xff]  ;;  %1380 = vmatpush1.msk.msra.mxu1 %vm283_vm1, %v1769_v4  ;;  %v209_v17 = vld [vmem:[#allocation3 + $0x68] sm:$0xff]  ;;  %v203_v24 = vld [vmem:[#allocation3 + $0x38] sm:$0xff] }
  0x1d   :  { %v1408_v14 = vpack.c.bf16 %v200_v12, %v196_v11  ;;  %v1797_v18 = vld [vmem:[%s1970_s2 + $0x8] sm:$0xff]  ;;  %1401 = vmatmul.mubr.msk.f32.vlgmr.msra.gmra.mrb[0].mxu0 %vm91_vm0, %v63_v9  ;;  %1407 = vmatprep.subr.bf16.mxu1 %v1406_v10  ;;  %v1410_v20 = vpack.c.bf16 %v209_v17, %v205_v16  ;;  %v1438_v26 = vpack.c.bf16 %v203_v24, %v199_v23  ;;  %v202_v31 = vld [vmem:[#allocation3 + $0x30] sm:$0xff]  ;;  %v207_v35 = vld [vmem:[#allocation3 + $0x58] sm:$0xff] }
  0x1e   :  { %v204_v19 = vld [vmem:[#allocation3 + $0x40] sm:$0xff]  ;;  %v1802_v21 = vcombine.high %v1797_v18, %v1797_v18  ;;  %1381 = vmatmul.mubr.msk.f32.vlgmr.msra.gmra.mrb[0].mxu1 %vm270_vm2, %v260_v13  ;;  %1403 = vmatprep.mubr.msk.f32.mxu0 %vm91_vm0, %v64_v15  ;;  %v213_v27 = vld [vmem:[#allocation3 + $0x88] sm:$0xff]  ;;  %v211_v36 = vld [vmem:[#allocation3 + $0x78] sm:$0xff]  ;;  %v1440_v39 = vpack.c.bf16 %v202_v31, %v198_v30 }
  0x1f   :  { %v208_v22 = vld [vmem:[#allocation3 + $0x60] sm:$0xff]  ;;  %v217_v28 = vld [vmem:[#allocation3 + $0xa8] sm:$0xff]  ;;  %1409 = vmatpush1.bf16.msra.mxu1 %v1408_v14  ;;  %362 = vmatprep.mubr.f32.mxu1 %v1663_v1  ;;  %v1442_v41 = vpack.c.bf16 %v211_v36, %v207_v35  ;;  %v206_v42 = vld [vmem:[#allocation3 + $0x50] sm:$0xff] }
  0x20   :  { %1385 = vmatprep.subr.msk.mxu0 %vm283_vm1, %v1802_v21  ;;  %v1412_v29 = vpack.c.bf16 %v208_v22, %v204_v19  ;;  %v212_v32 = vld [vmem:[#allocation3 + $0x80] sm:$0xff]  ;;  %1411 = vmatprep.subr.bf16.mxu1 %v1410_v20  ;;  %v1414_v33 = vpack.c.bf16 %v217_v28, %v213_v27  ;;  %v221_v37 = vld [vmem:[#allocation3 + $0xc8] sm:$0xff]  ;;  %v210_v43 = vld [vmem:[#allocation3 + $0x70] sm:$0xff] }
  0x21   :  { %1386 = vmatpush1.msk.msra.mxu0 %vm283_vm1, %v1797_v18  ;;  %v216_v34 = vld [vmem:[#allocation3 + $0xa0] sm:$0xff]  ;;  %v225_v38 = vld [vmem:[#allocation3 + $0xe8] sm:$0xff]  ;;  %v215_v47 = vld [vmem:[#allocation3 + $0x98] sm:$0xff]  ;;  %v1444_v51 = vpack.c.bf16 %v210_v43, %v206_v42 }
  0x22   :  { %1404 = vmatmul.mubr.msk.f32.gmra.mrb[2].mxu0 %vm91_vm0, %v65_v25  ;;  %1439 = vmatprep.subr.bf16.mxu0 %v1438_v26  ;;  %v1416_v40 = vpack.c.bf16 %v216_v34, %v212_v32  ;;  %v220_v44 = vld [vmem:[#allocation3 + $0xc0] sm:$0xff]  ;;  %v1418_v45 = vpack.c.bf16 %v225_v38, %v221_v37  ;;  %v219_v48 = vld [vmem:[#allocation3 + $0xb8] sm:$0xff]  ;;  %v229_v49 = vld [vmem:[#allocation3 + $0x108] sm:$0xff] }
  0x23   :  { %445 = vmatprep.mubr.f32.mxu0 %v1663_v1  ;;  %1413 = vmatpush1.bf16.msra.mxu1 %v1412_v29  ;;  %v224_v46 = vld [vmem:[#allocation3 + $0xe0] sm:$0xff]  ;;  %v233_v50 = vld [vmem:[#allocation3 + $0x128] sm:$0xff]  ;;  %v1446_v54 = vpack.c.bf16 %v219_v48, %v215_v47  ;;  %v214_v55 = vld [vmem:[#allocation3 + $0x90] sm:$0xff] }
  0x24   :  { %1415 = vmatprep.subr.bf16.mxu1 %v1414_v33  ;;  %v261_v52 = vld [vmem:[%s1976_s8 + $0x8] sm:$0xff]  ;;  %v1420_v53 = vpack.c.bf16 %v224_v46, %v220_v44  ;;  %v218_v56 = vld [vmem:[#allocation3 + $0xb0] sm:$0xff]  ;;  %v1422_v58 = vpack.c.bf16 %v233_v50, %v229_v49  ;;  %v223_v60 = vld [vmem:[#allocation3 + $0xd8] sm:$0xff] }
  0x25   :  { %v228_v57 = vld [vmem:[#allocation3 + $0x100] sm:$0xff]  ;;  %v227_v61 = vld [vmem:[#allocation3 + $0xf8] sm:$0xff]  ;;  %1382 = vmatmul.mubr.msk.f32.gmra.mrb[2].mxu1 %vm270_vm2, %v261_v52  ;;  %v237_v62 = vld [vmem:[#allocation3 + $0x148] sm:$0xff]  ;;  %v1448_v3 = vpack.c.bf16 %v218_v56, %v214_v55 }
  0x26   :  { %1387 = vmatmul.mubr.msk.f32.vlgmr.msra.gmra.mrb[4].mxu0 %vm270_vm2, %v260_v13  ;;  %v232_v59 = vld [vmem:[#allocation3 + $0x120] sm:$0xff]  ;;  %v241_v63 = vld [vmem:[#allocation3 + $0x168] sm:$0xff]  ;;  %368 = vmatprep.mubr.f32.mxu1 %v1663_v1  ;;  %v1450_v7 = vpack.c.bf16 %v227_v61, %v223_v60  ;;  %v222_v8 = vld [vmem:[#allocation3 + $0xd0] sm:$0xff] }
  0x27   :  { %1441 = vmatpush1.bf16.msra.mxu0 %v1440_v39  ;;  %451 = vmatprep.mubr.f32.mxu0 %v1663_v1  ;;  %v262_v0 = vld [vmem:[%s1976_s8 + $0x10] sm:$0xff]  ;;  %v1424_v5 = vpack.c.bf16 %v232_v59, %v228_v57  ;;  %v236_v10 = vld [vmem:[#allocation3 + $0x140] sm:$0xff]  ;;  %v1426_v11 = vpack.c.bf16 %v241_v63, %v237_v62  ;;  %v231_v13 = vld [vmem:[#allocation3 + $0x118] sm:$0xff] }
  0x28   :  { %1417 = vmatpush1.bf16.msra.mxu1 %v1416_v40  ;;  %1443 = vmatprep.subr.bf16.mxu0 %v1442_v41  ;;  %v226_v9 = vld [vmem:[#allocation3 + $0xf0] sm:$0xff]  ;;  %v240_v12 = vld [vmem:[#allocation3 + $0x160] sm:$0xff]  ;;  %v235_v14 = vld [vmem:[#allocation3 + $0x138] sm:$0xff] }
  0x29   :  { %1419 = vmatprep.subr.bf16.mxu1 %v1418_v45  ;;  %1383 = vmatmul.mubr.msk.f32.gmra.mrb[4].mxu1 %vm270_vm2, %v262_v0  ;;  %v245_v15 = vld [vmem:[#allocation3 + $0x188] sm:$0xff]  ;;  %v263_v17 = vld [vmem:[%s1976_s8 + $0x18] sm:$0xff]  ;;  %v1452_v19 = vpack.c.bf16 %v226_v9, %v222_v8  ;;  %v1428_v20 = vpack.c.bf16 %v240_v12, %v236_v10  ;;  %v1454_v22 = vpack.c.bf16 %v235_v14, %v231_v13  ;;  %v244_v25 = vld [vmem:[#allocation3 + $0x180] sm:$0xff]  ;;  %v1665_v14 = vmov 1  }
  0x2a   :  { %1388 = vmatmul.mubr.msk.f32.gmra.mrb[6].mxu0 %vm270_vm2, %v261_v52  ;;  %v249_v16 = vld [vmem:[#allocation3 + $0x1a8] sm:$0xff]  ;;  %374 = vmatprep.mubr.f32.mxu1 %v1663_v1  ;;  %v230_v23 = vld [vmem:[#allocation3 + $0x110] sm:$0xff]  ;;  %v248_v27 = vld [vmem:[#allocation3 + $0x1a0] sm:$0xff] }
  0x2b   :  { %1445 = vmatpush1.bf16.msra.mxu0 %v1444_v51  ;;  %457 = vmatprep.mubr.f32.mxu0 %v1663_v1  ;;  %v234_v24 = vld [vmem:[#allocation3 + $0x130] sm:$0xff]  ;;  %v1430_v26 = vpack.c.bf16 %v249_v16, %v245_v15  ;;  %v239_v28 = vld [vmem:[#allocation3 + $0x158] sm:$0xff]  ;;  %v253_v30 = vld [vmem:[#allocation3 + $0x1c8] sm:$0xff]  ;;  %v1432_v35 = vpack.c.bf16 %v248_v27, %v244_v25 }
  0x2c   :  { %1421 = vmatpush1.bf16.msra.mxu1 %v1420_v53  ;;  %1447 = vmatprep.subr.bf16.mxu0 %v1446_v54  ;;  %v243_v29 = vld [vmem:[#allocation3 + $0x178] sm:$0xff]  ;;  %v257_v31 = vld [vmem:[#allocation3 + $0x1e8] sm:$0xff]  ;;  %v1456_v32 = vpack.c.bf16 %v234_v24, %v230_v23  ;;  %v238_v33 = vld [vmem:[#allocation3 + $0x150] sm:$0xff] }
  0x2d   :  { %1423 = vmatprep.subr.bf16.mxu1 %v1422_v58  ;;  %1384 = vmatmul.mubr.msk.f32.gmra.mrb[6].mxu1 %vm270_vm2, %v263_v17  ;;  %v67_v34 = vld [vmem:[%s1974_s6] sm:$0xff]  ;;  %v1458_v36 = vpack.c.bf16 %v243_v29, %v239_v28  ;;  %v242_v37 = vld [vmem:[#allocation3 + $0x170] sm:$0xff]  ;;  %v1434_v40 = vpack.c.bf16 %v257_v31, %v253_v30  ;;  %v68_v44 = vld [vmem:[%s1974_s6 + $0x8] sm:$0xff] }
  0x2e   :  { %1389 = vmatmul.mubr.msk.f32.gmra.mrb[8].mxu0 %vm270_vm2, %v262_v0  ;;  %534 = vmatprep.mubr.f32.mxu1 %v1663_v1  ;;  %v252_v38 = vld [vmem:[#allocation3 + $0x1c0] sm:$0xff]  ;;  %v69_v39 = vld [vmem:[%s1974_s6 + $0x10] sm:$0xff]  ;;  %v247_v42 = vld [vmem:[#allocation3 + $0x198] sm:$0xff]  ;;  %v1460_v45 = vpack.c.bf16 %v242_v37, %v238_v33 }
  0x2f   :  { %1449 = vmatpush1.bf16.msra.mxu0 %v1448_v3  ;;  %463 = vmatprep.mubr.f32.mxu0 %v1663_v1  ;;  %v256_v41 = vld [vmem:[#allocation3 + $0x1e0] sm:$0xff]  ;;  %v251_v43 = vld [vmem:[#allocation3 + $0x1b8] sm:$0xff]  ;;  %v246_v49 = vld [vmem:[#allocation3 + $0x190] sm:$0xff] }
  0x30   :  { %1425 = vmatpush1.bf16.msra.mxu1 %v1424_v5  ;;  %1451 = vmatprep.subr.bf16.mxu0 %v1450_v7  ;;  %v70_v46 = vld [vmem:[%s1974_s6 + $0x18] sm:$0xff]  ;;  %v1436_v47 = vpack.c.bf16 %v256_v41, %v252_v38  ;;  %v1462_v48 = vpack.c.bf16 %v251_v43, %v247_v42  ;;  %v648_v53 = vld [vmem:[%s1977_s9] sm:$0xff]  ;;  %v649_v55 = vld [vmem:[%s1977_s9 + $0x8] sm:$0xff] }
  0x31   :  { %1427 = vmatprep.subr.bf16.mxu1 %v1426_v11  ;;  %73 = vperm.xlu0 %1512, %v67_v34   ;;  %v250_v50 = vld [vmem:[#allocation3 + $0x1b0] sm:$0xff]  ;;  %v255_v51 = vld [vmem:[#allocation3 + $0x1d8] sm:$0xff]  ;;  %v193_v63 = vld [vmem:[%s1975_s7 + $0x8] sm:$0xff] }
  0x32   :  { %1390 = vmatmul.mubr.msk.f32.gmra.mrb[10].mxu0 %vm270_vm2, %v263_v17  ;;  %83 = vperm.xlu1 %1513, %v69_v39   ;;  %v259_v52 = vld [vmem:[#allocation3 + $0x1f8] sm:$0xff]  ;;  %v1464_v54 = vpack.c.bf16 %v250_v50, %v246_v49  ;;  %v254_v58 = vld [vmem:[#allocation3 + $0x1d0] sm:$0xff] }
  0x33   :  { %1453 = vmatpush1.bf16.msra.mxu0 %v1452_v19  ;;  %623 = vmatprep.mubr.f32.mxu0 %v1663_v1  ;;  %v192_v56 = vld [vmem:[%s1975_s7] sm:$0xff]  ;;  %v1466_v57 = vpack.c.bf16 %v259_v52, %v255_v51  ;;  %v258_v59 = vld [vmem:[#allocation3 + $0x1f0] sm:$0xff] }
  0x34   :  { %1429 = vmatpush1.bf16.msra.mxu1 %v1428_v20  ;;  %1455 = vmatprep.subr.bf16.mxu0 %v1454_v22  ;;  %v651_v60 = vld [vmem:[%s1977_s9 + $0x18] sm:$0xff]  ;;  %v1468_v61 = vpack.c.bf16 %v258_v59, %v254_v58  ;;  %v650_v62 = vld [vmem:[%s1977_s9 + $0x10] sm:$0xff]  ;;  %v850_v34 = vld [vmem:[#allocation2] sm:$0x1] }
  0x35   :  { %1431 = vmatprep.subr.bf16.mxu1 %v1430_v26  ;;  %78 = vperm.xlu0 %1512, %v68_v44   ;;  %v194_v0 = vld [vmem:[%s1975_s7 + $0x10] sm:$0xff]  ;;  %v195_v3 = vld [vmem:[%s1975_s7 + $0x18] sm:$0xff] }
  0x36   :  { %88 = vperm.xlu1 %1513, %v70_v46  }
  0x37   :  { %1457 = vmatpush1.bf16.msra.mxu0 %v1456_v32 }
  0x38   :  { %1433 = vmatpush1.bf16.msra.mxu1 %v1432_v35  ;;  %1459 = vmatprep.subr.bf16.mxu0 %v1458_v36 }
  0x39   :  { %1435 = vmatprep.subr.bf16.mxu1 %v1434_v40  ;;  %654 = vperm.xlu0 %1512, %v648_v53  }
  0x3a   :  { %659 = vperm.xlu1 %1513, %v649_v55  }
  0x3b   :  { %1461 = vmatpush1.bf16.msra.mxu0 %v1460_v45 }
  0x3c   :  { %1437 = vmatpush1.bf16.msra.mxu1 %v1436_v47  ;;  %1463 = vmatprep.subr.bf16.mxu0 %v1462_v48 }
  0x3d   :  { %669 = vperm.xlu0 %1512, %v651_v60  }
  0x3e   :  { %664 = vperm.xlu1 %1513, %v650_v62  }
  0x3f   :  { %535 = vmatmul.mubr.f32.vlgmr.msra.gmra.mrb[0].mxu1 %v192_v56  ;;  %1465 = vmatpush1.bf16.msra.mxu0 %v1464_v54 }
  0x40   :  { %540 = vmatprep.mubr.f32.mxu1 %v1663_v1  ;;  %1467 = vmatprep.subr.bf16.mxu0 %v1466_v57 }
  0x43   :  { %541 = vmatmul.mubr.f32.gmra.mrb[2].mxu1 %v193_v63  ;;  %1469 = vmatpush1.bf16.msra.mxu0 %v1468_v61 }
  0x44   :  { %546 = vmatprep.mubr.f32.mxu1 %v1663_v1  ;;  %1185 = vmatprep.subr.mxu0 %v1777_v6 }
  0x46   :  { %624 = vmatmul.mubr.f32.vlgmr.msra.gmra.mrb[4].mxu0 %v192_v56 }
  0x47   :  { %547 = vmatmul.mubr.f32.gmra.mrb[4].mxu1 %v194_v0  ;;  %629 = vmatprep.mubr.f32.mxu0 %v1663_v1 }
  0x48   :  { %552 = vmatprep.mubr.f32.mxu1 %v1663_v1 }
  0x4a   :  { %630 = vmatmul.mubr.f32.gmra.mrb[6].mxu0 %v193_v63 }
  0x4b   :  { %553 = vmatmul.mubr.f32.gmra.mrb[6].mxu1 %v195_v3  ;;  %635 = vmatprep.mubr.f32.mxu0 %v1663_v1 }
  0x4c   :  { %927 = vmatprep.mubr.f32.mxu1 %v1663_v1  ;;  %1186 = vmatpush1.xpose.msra.mxu0 %v1769_v4 }
  0x4e   :  { %636 = vmatmul.mubr.f32.gmra.mrb[8].mxu0 %v194_v0 }
  0x4f   :  { %641 = vmatprep.mubr.f32.mxu0 %v1663_v1 }
  0x52   :  { %642 = vmatmul.mubr.f32.gmra.mrb[10].mxu0 %v195_v3 }
  0xb0   :  { %v74_v6 = vpop.permute.xlu0 %73 }
  0xb1   :  { %v84_v11 = vpop.permute.xlu1 %83 }
  0xb4   :  { %v79_v5 = vpop.permute.xlu0 %78 }
  0xb5   :  { %v89_v4 = vpop.permute.xlu1 %88 }
  0xb8   :  { %v655_v36 = vpop.permute.xlu0 %654 }
  0xbc   :  { %v670_v38 = vpop.permute.xlu0 %669 }
  0xf0   :  { %v1402_v7 = vpop.f32.mrb[0].mxu0 }
  0xf1   :  { %v179_v8 = vadd.f32 %v1402_v7, %v79_v5  ;;  %v173_v9 = vpop.f32.mrb[1].mxu0 }
  0xf2   :  { %v174_v10 = vadd.f32 %v173_v9, %v74_v6 }
  0xf3   :  { %740 = vperm.xlu1 %1513, %v179_v8  }
  0xf4   :  { %735 = vperm.xlu0 %1512, %v174_v10  }
  0xf5   :  { %v1405_v12 = vpop.f32.mrb[2].mxu0 }
  0xf6   :  { %v183_v13 = vpop.f32.mrb[3].mxu0  ;;  %v189_v15 = vadd.f32 %v1405_v12, %v89_v4 }
  0xf7   :  { %1514 = vset.pattern.permute.xlu1 %v1665_v14  ;;  %v184_v16 = vadd.f32 %v183_v13, %v84_v11 }
  0xf8   :  { %790 = vperm.xlu1 %1514, %v179_v8   ;;  %1515 = vset.pattern.permute.xlu0 %v1665_v14 }
  0xf9   :  { %786 = vperm.xlu0 %1515, %v174_v10  }
  0xfc   :  { %1516 = vset.pattern.permute.xlu1 %v1664_v2 }
  0xfd   :  { %750 = vperm.xlu1 %1516, %v189_v15   ;;  %794 = vperm.xlu0 %1515, %v184_v16  }
 0x101   :  { %745 = vperm.xlu1 %1516, %v184_v16   ;;  %1519 = vset.pattern.permute.xlu0 %v1664_v2 }
 0x105   :  { %1517 = vset.pattern.permute.xlu1 %v1665_v14 }
 0x106   :  { %798 = vperm.xlu1 %1517, %v189_v15  }
 0x10a   :  { %1518 = vset.pattern.permute.xlu1 %v1664_v2  ;;  %v660_v2 = vpop.permute.xlu1 %659 }
 0x10b   :  { %853 = vperm.xlu1 %1518, %v850_v34  }
 0x10e   :  { %v665_v37 = vpop.permute.xlu1 %664 }
 0x112   :  { %v536_v17 = vpop.f32.mrb[0].mxu1 }
 0x113   :  { %v538_v19 = vpop.f32.mrb[1].mxu1  ;;  %v672_v49 = vadd.f32 %v655_v36, %v536_v17 }
 0x114   :  { %v673_v51 = vadd.f32 %v655_v36, %v538_v19 }
 0x116   :  { %v542_v20 = vpop.f32.mrb[2].mxu1 }
 0x117   :  { %v544_v22 = vpop.f32.mrb[3].mxu1  ;;  %v676_v45 = vadd.f32 %v660_v2, %v542_v20 }
 0x118   :  { %v677_v46 = vadd.f32 %v660_v2, %v544_v22 }
 0x119   :  { %v625_v23 = vpop.f32.mrb[4].mxu0 }
 0x11a   :  { %v548_v24 = vpop.f32.mrb[4].mxu1  ;;  %v627_v25 = vpop.f32.mrb[5].mxu0  ;;  %v674_v50 = vadd.f32 %v655_v36, %v625_v23 }
 0x11b   :  { %v550_v26 = vpop.f32.mrb[5].mxu1  ;;  %v675_v52 = vadd.f32 %v655_v36, %v627_v25  ;;  %v680_v12 = vadd.f32 %v665_v37, %v548_v24 }
 0x11c   :  { %v681_v13 = vadd.f32 %v665_v37, %v550_v26 }
 0x11d   :  { %v631_v27 = vpop.f32.mrb[6].mxu0 }
 0x11e   :  { %v1887_v28 = vpop.f32.mrb[6].mxu1  ;;  %v633_v29 = vpop.f32.mrb[7].mxu0  ;;  %v678_v40 = vadd.f32 %v660_v2, %v631_v27 }
 0x11f   :  { %v1889_v30 = vpop.f32.mrb[7].mxu1  ;;  %v679_v41 = vadd.f32 %v660_v2, %v633_v29  ;;  %v684_v23 = vadd.f32 %v670_v38, %v1887_v28 }
 0x120   :  { %v685_v25 = vadd.f32 %v670_v38, %v1889_v30 }
 0x121   :  { %v637_v31 = vpop.f32.mrb[8].mxu0 }
 0x122   :  { %v639_v32 = vpop.f32.mrb[9].mxu0  ;;  %v682_v14 = vadd.f32 %v665_v37, %v637_v31 }
 0x123   :  { %v683_v4 = vadd.f32 %v665_v37, %v639_v32 }
 0x125   :  { %v643_v33 = vpop.f32.mrb[10].mxu0 }
 0x126   :  { %v1891_v35 = vpop.f32.mrb[11].mxu0  ;;  %v686_v27 = vadd.f32 %v670_v38, %v643_v33 }
 0x127   :  { %v687_v32 = vadd.f32 %v670_v38, %v1891_v35 }
 0x172   :  { %v741_v39 = vpop.permute.xlu1 %740 }
 0x173   :  { %v759_v42 = vmul.f32 0.0, %v741_v39  ;;  %v736_v43 = vpop.permute.xlu0 %735  ;;  %v773_v53 = vadd.f32 %v741_v39, %v676_v45  ;;  %v774_v54 = vadd.f32 %v741_v39, %v677_v46 }
 0x174   :  { %v755_v44 = vmul.f32 0.0, %v736_v43  ;;  %v769_v61 = vadd.f32 %v736_v43, %v672_v49  ;;  %v770_v62 = vadd.f32 %v736_v43, %v673_v51 }
 0x175   :  { %v775_v47 = vadd.f32 %v759_v42, %v678_v40  ;;  %v776_v48 = vadd.f32 %v759_v42, %v679_v41 }
 0x176   :  { %v771_v59 = vadd.f32 %v755_v44, %v674_v50  ;;  %v772_v63 = vadd.f32 %v755_v44, %v675_v52 }
 0x177   :  { %v791_v55 = vpop.permute.xlu1 %790 }
 0x178   :  { %v805_v56 = vmul.f32 0.0, %v791_v55  ;;  %v823_v57 = vadd.f32 %v791_v55, %v775_v47  ;;  %v824_v58 = vadd.f32 %v791_v55, %v776_v48  ;;  %v787_v60 = vpop.permute.xlu0 %786 }
 0x179   :  { %v801_v0 = vmul.f32 0.0, %v787_v60  ;;  %v819_v8 = vadd.f32 %v787_v60, %v771_v59  ;;  %v820_v10 = vadd.f32 %v787_v60, %v772_v63 }
 0x17a   :  { %v821_v3 = vadd.f32 %v805_v56, %v773_v53  ;;  %v822_v6 = vadd.f32 %v805_v56, %v774_v54  ;;  %1522 = vtanh.f32 %v823_v57 }
 0x17b   :  { %1524 = vtanh.f32 %v824_v58  ;;  %v817_v5 = vadd.f32 %v801_v0, %v769_v61  ;;  %v818_v7 = vadd.f32 %v801_v0, %v770_v62 }
 0x17c   :  { %1526 = vtanh.f32 %v821_v3  ;;  %v751_v9 = vpop.permute.xlu1 %750  ;;  %v795_v11 = vpop.permute.xlu0 %794 }
 0x17d   :  { %1528 = vtanh.f32 %v822_v6  ;;  %v767_v15 = vmul.f32 0.0, %v751_v9  ;;  %v809_v16 = vmul.f32 0.0, %v795_v11  ;;  %v781_v2 = vadd.f32 %v751_v9, %v684_v23  ;;  %v849_v6 = vld [vmem:[%s1978_s10] sm:$0x1] }
 0x17e   :  { %1530 = vtanh.f32 %v817_v5  ;;  %v782_v39 = vadd.f32 %v751_v9, %v685_v25  ;;  %v856_v5 = vlaneseq }
 0x17f   :  { %1532 = vtanh.f32 %v818_v7  ;;  %v783_v36 = vadd.f32 %v767_v15, %v686_v27  ;;  %v784_v28 = vadd.f32 %v767_v15, %v687_v32 }
 0x180   :  { %1534 = vtanh.f32 %v819_v8  ;;  %v746_v17 = vpop.permute.xlu1 %745  ;;  %v1905_v7 = vshrl.u32 %v856_v5, 7  ;;  %vm1122_vm4 = vcmp.lt.s32.totalorder %v856_v5, 512 }
 0x181   :  { %1536 = vtanh.f32 %v820_v10  ;;  %v763_v19 = vmul.f32 0.0, %v746_v17  ;;  %v777_v20 = vadd.f32 %v746_v17, %v680_v12  ;;  %v778_v22 = vadd.f32 %v746_v17, %v681_v13 }
 0x182   :  { %v1908_v8 = vsub.s32 0, %v1905_v7 }
 0x183   :  { %v779_v29 = vadd.f32 %v763_v19, %v682_v14  ;;  %v780_v34 = vadd.f32 %v763_v19, %v683_v4  ;;  %v825_v24 = vadd.f32 %v809_v16, %v777_v20  ;;  %v826_v26 = vadd.f32 %v809_v16, %v778_v22 }
 0x184   :  { %v1523_v31 = vpop.eup %1522 }
 0x185   :  { %v1525_v37 = vpop.eup %1524  ;;  %v827_v40 = vadd.f32 %v795_v11, %v779_v29  ;;  %v828_v41 = vadd.f32 %v795_v11, %v780_v34  ;;  %1538 = vtanh.f32 %v825_v24  ;;  %v799_v42 = vpop.permute.xlu1 %798 }
 0x186   :  { %v1527_v43 = vpop.eup %1526  ;;  %1540 = vtanh.f32 %v826_v26  ;;  %v813_v30 = vmul.f32 0.0, %v799_v42  ;;  %v831_v33 = vadd.f32 %v799_v42, %v783_v36  ;;  %v832_v35 = vadd.f32 %v799_v42, %v784_v28  ;;  %v1027_v36 = vld [vmem:[%s1972_s4] sm:$0xf] }
 0x187   :  { %v1529_v44 = vpop.eup %1528  ;;  %1542 = vtanh.f32 %v827_v40  ;;  %v1043_v40 = vsub.s32 3, %v1905_v7 }
 0x188   :  { %v1531_v45 = vpop.eup %1530  ;;  %1544 = vtanh.f32 %v828_v41  ;;  %v829_v46 = vadd.f32 %v813_v30, %v781_v2  ;;  %v830_v47 = vadd.f32 %v813_v30, %v782_v39  ;;  %v1039_v39 = vsub.s32 2, %v1905_v7 }
 0x189   :  { %v1533_v38 = vpop.eup %1532  ;;  %1546 = vtanh.f32 %v831_v33  ;;  %v1472_v48 = vpack.c.bf16 %v1527_v43, %v1531_v45  ;;  %v1032_v41 = vrot.slane %v1027_v36, %v1908_v8  ;;  %v1044_v30 = vrot.slane %v1027_v36, %v1043_v40 }
 0x18a   :  { %v1535_v49 = vpop.eup %1534  ;;  %1548 = vtanh.f32 %v829_v46  ;;  %v1470_v50 = vpack.c.bf16 %v1529_v44, %v1533_v38  ;;  %v854_v9 = vpop.permute.xlu1 %853  ;;  %v1040_v43 = vrot.slane %v1027_v36, %v1039_v39 }
 0x18b   :  { %v1537_v51 = vpop.eup %1536  ;;  %1550 = vtanh.f32 %v830_v47  ;;  %v1480_v52 = vpack.c.bf16 %v1523_v31, %v1535_v49 }
 0x18c   :  { %1552 = vtanh.f32 %v832_v35  ;;  %1471 = vmatprep.subr.bf16.mxu1 %v1470_v50  ;;  %v1478_v53 = vpack.c.bf16 %v1525_v37, %v1537_v51  ;;  %v1035_v37 = vsub.s32 1, %v1905_v7 }
 0x18d   :  { %1473 = vmatpush1.bf16.msra.mxu1 %v1472_v48 }
 0x18e   :  { %v1036_v42 = vrot.slane %v1027_v36, %v1035_v37 }
 0x18f   :  { %v1539_v54 = vpop.eup %1538 }
 0x190   :  { %v1541_v55 = vpop.eup %1540 }
 0x191   :  { %v1543_v56 = vpop.eup %1542 }
 0x192   :  { %v1545_v57 = vpop.eup %1544 }
 0x193   :  { %v1547_v58 = vpop.eup %1546 }
 0x194   :  { %v1549_v59 = vpop.eup %1548  ;;  %v1484_v60 = vpack.c.bf16 %v1547_v58, %v1543_v56 }
 0x195   :  { %v1551_v61 = vpop.eup %1550  ;;  %v1476_v62 = vpack.c.bf16 %v1549_v59, %v1539_v54 }
 0x196   :  { %v1553_v63 = vpop.eup %1552  ;;  %v1474_v0 = vpack.c.bf16 %v1551_v61, %v1541_v55 }
 0x197   :  { %v1482_v3 = vpack.c.bf16 %v1553_v63, %v1545_v57 }
 0x198   :  { %1475 = vmatprep.subr.bf16.mxu1 %v1474_v0  ;;  %v1125_v0 = vld [vmem:[%s1971_s3] sm:$0xf]  ;;  %s1667_s3 = smov [#allocation7]  }
 0x199   :  { %1477 = vmatpush1.bf16.msra.mxu1 %v1476_v62  ;;  %v1666_v62 = vmov 1966171168   ;;  %s1348_s15 = sshll.u32 %s1667_s3, 4  ;;  %s1349_s15 = int_to_ptr.vmem [resolvable:$true] %s1348_s15 }
 0x19a   :  { %1479 = vmatprep.subr.bf16.mxu1 %v1478_v53  ;;  %v1098_v63 = vunpack.c.l.s4 %v1666_v62  ;;  %s1588_s1 = scalar_lea.vmem %s1349_s15, 64  ;;  %p1593_p9 = scmp.lt.s32.totalorder %s1349_s15, %s1349_s15 }
 0x19b   :  { %p1589_p8 = scmp.ne.s32.totalorder %s1349_s15, %s1588_s1  ;;  %p1594_p10 = scmp.lt.s32.totalorder %s1588_s1, %s1588_s1 }
 0x19c   :  { %1391 = vmatmul.mubr.msk.f32.vlgmr.msra.gmra.mrb[8].mxu1 %vm91_vm0, %v849_v6 }
 0x19d   :  { %1481 = vmatpush1.bf16.msra.mxu1 %v1480_v52  ;;  %998 = vmatprep.mubr.f32.mxu1 %v1663_v1  ;;  %v859_v1 = vrot.slane %v854_v9, %v1908_v8  ;;  %p1595_p11 = por %p1594_p10, %p1593_p9 }
 0x19e   :  { %1483 = vmatprep.subr.bf16.mxu1 %v1482_v3  ;;  %v1099_v3 = vunpack.c.0.s8 %v1098_v63 }
 0x19f   :  { %p1596_p12 = pnand %p1595_p11, %p1589_p8 }
 0x1a1   :  { %1485 = vmatpush1.bf16.msra.mxu1 %v1484_v60 }
 0x1a2   :  { %1261 = vmatprep.subr.mxu1 %v1802_v21 }
 0x1a4   :  { %1392 = vmatmul.mubr.msk.f32.vlgmr.msra.gmra.mrb[10].mxu1 %vm91_vm0, %v849_v6  ;;  %v1142_v6 = vrot.slane %v1125_v0, %v1043_v40 }
 0x1aa   :  { %1262 = vmatpush1.xpose.msra.mxu1 %v1797_v18 }
 0x26f   :  { %v929_v10 = vpop.f32.mrb[8].mxu1 }
 0x270   :  { %v931_v11 = vpop.f32.mrb[9].mxu1  ;;  %v930_v12 = vadd.f32 %v929_v10, %v859_v1  ;;  %v1130_v10 = vrot.slane %v1125_v0, %v1908_v8 }
 0x271   :  { %v932_v13 = vadd.f32 %v931_v11, %v859_v1  ;;  %v1138_v11 = vrot.slane %v1125_v0, %v1039_v39 }
 0x272   :  { %v1006_v18 = vsel %vm1005_vm3, %v930_v12, -inf }
 0x273   :  { %v1007_v15 = vsel %vm1005_vm3, %v932_v13, -inf }
 0x274   :  { %v1010_v20 = vmax.f32 %v1006_v18, %v1007_v15 }
 0x277   :  { %v1000_v21 = vpop.f32.mrb[10].mxu1 }
 0x278   :  { %v1001_v14 = vadd.f32 %v1000_v21, %v859_v1  ;;  %v1002_v4 = vpop.f32.mrb[11].mxu1  ;;  %v1102_v21 = vsub.s32 %v1099_v3, %v1905_v7 }
 0x279   :  { %v1003_v16 = vadd.f32 %v1002_v4, %v859_v1  ;;  %v1134_v1 = vrot.slane %v1125_v0, %v1035_v37 }
 0x27a   :  { %v1008_v17 = vsel %vm1005_vm3, %v1001_v14, -inf }
 0x27b   :  { %v1009_v19 = vsel %vm1005_vm3, %v1003_v16, -inf }
 0x27c   :  { %v1011_v22 = vmax.f32 %v1008_v17, %v1009_v19 }
 0x27e   :  { %v1012_v23 = vmax.f32 %v1010_v20, %v1011_v22 }
 0x280   :  { %1013 = vmax.xlane.f32.xlu0 %v1012_v23 }
 0x30d   :  { %v1014_v25 = vpop.xlane.xlu0 %1013 }
 0x30e   :  { %v1015_v27 = vsub.f32 %v930_v12, %v1014_v25  ;;  %v1016_v29 = vsub.f32 %v932_v13, %v1014_v25  ;;  %v1017_v34 = vsub.f32 %v1001_v14, %v1014_v25  ;;  %v1018_v24 = vsub.f32 %v1003_v16, %v1014_v25 }
 0x310   :  { %v1019_v26 = vmul.f32 1.442695, %v1015_v27  ;;  %v1021_v31 = vmul.f32 1.442695, %v1016_v29  ;;  %v1023_v32 = vmul.f32 1.442695, %v1017_v34 }
 0x311   :  { %v1025_v2 = vmul.f32 1.442695, %v1018_v24 }
 0x312   :  { %1554 = vpow2.f32 %v1019_v26 }
 0x313   :  { %1556 = vpow2.f32 %v1021_v31 }
 0x314   :  { %1558 = vpow2.f32 %v1023_v32 }
 0x315   :  { %1560 = vpow2.f32 %v1025_v2 }
 0x31c   :  { %v1555_v28 = vpop.eup %1554 }
 0x31d   :  { %v1557_v33 = vpop.eup %1556  ;;  %v1049_v44 = vmul.f32 %v1555_v28, %v1032_v41 }
 0x31e   :  { %v1559_v45 = vpop.eup %1558  ;;  %v1050_v46 = vmul.f32 %v1557_v33, %v1036_v42 }
 0x31f   :  { %v1561_v47 = vpop.eup %1560  ;;  %v1051_v35 = vmul.f32 %v1559_v45, %v1040_v43  ;;  %v1053_v38 = vsel %vm1005_vm3, %v1049_v44, 0.0 }
 0x320   :  { %v1052_v48 = vmul.f32 %v1561_v47, %v1044_v30  ;;  %v1054_v49 = vsel %vm1005_vm3, %v1050_v46, 0.0 }
 0x321   :  { %v1066_v50 = vsel %vm1005_vm3, %v1051_v35, 0.0  ;;  %v1055_v51 = vadd.f32 %v1054_v49, %v1053_v38 }
 0x322   :  { %v1067_v52 = vsel %vm1005_vm3, %v1052_v48, 0.0 }
 0x323   :  { %v1068_v53 = vadd.f32 %v1067_v52, %v1066_v50  ;;  %1056 = vadd.xlane.f32.xlu1 %v1055_v51 }
 0x325   :  { %1069 = vadd.xlane.f32.xlu0 %v1068_v53 }
 0x3b0   :  { %v1057_v54 = vpop.xlane.xlu1 %1056 }
 0x3b1   :  { %v1060_v55 = vmul.f32 0.0, %v1057_v54 }
 0x3b2   :  { %v1070_v56 = vpop.xlane.xlu0 %1069 }
 0x3b3   :  { %v1071_v57 = vmul.f32 0.0, %v1070_v56  ;;  %v1077_v58 = vadd.f32 %v1070_v56, %v1060_v55 }
 0x3b5   :  { %v1075_v59 = vadd.f32 %v1071_v57, %v1057_v54  ;;  %v1081_v60 = vadd.f32 1e-10, %v1077_v58 }
 0x3b7   :  { %v1079_v61 = vadd.f32 1e-10, %v1075_v59  ;;  %1562 = vrcp.f32 %v1081_v60 }
 0x3b9   :  { %1564 = vrcp.f32 %v1079_v61 }
 0x3c1   :  { %v1563_v9 = vpop.eup %1562 }
 0x3c2   :  { %v1090_v12 = vmul.f32 %v1563_v9, %v1052_v48  ;;  %v1089_v13 = vmul.f32 %v1563_v9, %v1051_v35 }
 0x3c3   :  { %v1565_v14 = vpop.eup %1564 }
 0x3c4   :  { %v1087_v4 = vmul.f32 %v1565_v14, %v1049_v44  ;;  %v1088_v18 = vmul.f32 %v1565_v14, %v1050_v46  ;;  %v1150_v15 = vadd.f32 %v1142_v6, %v1090_v12  ;;  %1325 = vmatprep.mubr.f32.mxu1 %v1090_v12  ;;  %v1096_v16 = vcombine.low %v1089_v13, %v1090_v12 }
 0x3c5   :  { %v1149_v17 = vadd.f32 %v1138_v11, %v1089_v13  ;;  %1326 = vmatmul.mubr.f32.vlgmr.msra.gmra.mrb[12].mxu1 %v1089_v13 }
 0x3c6   :  { %v1095_v19 = vcombine.low %v1087_v4, %v1088_v18  ;;  %v1147_v20 = vadd.f32 %v1130_v10, %v1087_v4  ;;  %v1148_v22 = vadd.f32 %v1134_v1, %v1088_v18  ;;  %1249 = vmatprep.mubr.f32.mxu0 %v1088_v18  ;;  %v1110_v23 = vrot.slane %v1096_v16, %v1102_v21 }
 0x3c7   :  { %1250 = vmatmul.mubr.f32.vlgmr.msra.gmra.mrb[12].mxu0 %v1087_v4  ;;  %v1156_v8 = vcombine.low %v1149_v17, %v1150_v15 }
 0x3c8   :  { %v1155_v25 = vcombine.low %v1147_v20, %v1148_v22  ;;  %v1103_v27 = vrot.slane %v1095_v19, %v1102_v21 }
 0x3c9   :  { %v1170_v29 = vrot.slane %v1156_v8, %v1102_v21 }
 0x3ca   :  { %v1111_v34 = vcombine.low %v1103_v27, %v1110_v23  ;;  %v1163_v7 = vrot.slane %v1155_v25, %v1102_v21 }
 0x3cc   :  { %v1118_v24 = vrot.slane %v1111_v34, %v1102_v21  ;;  %v1171_v26 = vcombine.low %v1163_v7, %v1170_v29 }
 0x3ce   :  { %1124 = vst.msk [vmem:[#allocation7] sm:$0xf] %vm1122_vm4, %v1118_v24  ;;  %v1178_v31 = vrot.slane %v1171_v26, %v1102_v21 }
 0x3d0   :  { %1180 = vst.msk [vmem:[#allocation9] sm:$0xf] %vm1122_vm4, %v1178_v31 }
 0x3d1   :  { %1599 = shalt.err (!%p1596_p12)
}
 0x3d2   :  { %s1600_s17 = scalar_lea.hbm %s1981_s13, 64 }
 0x3d3   :  { %p1601_p13 = scmp.ne.s32.totalorder %s1981_s13, %s1600_s17  ;;  %p1604_p0 = scmp.lt.u32.totalorder %s1600_s17, %s1981_s13 }
 0x3d5   :  { %p1606_p1 = pnand %p1604_p0, %p1601_p13 }
 0x3d7   :  { %1609 = shalt.err (!%p1606_p1)
}
 0x3d8   :  { %1351 = dma.vmem_to_hbm [thread:$0]  %s1349_s15, 64, %s1981_s13, [#allocation8]  }
 0x3d9   :  { %s1668_s23 = smov [#allocation9]  }
 0x3da   :  { %s1358_s11 = sshll.u32 %s1668_s23, 4  ;;  %s1359_s11 = int_to_ptr.vmem [resolvable:$true] %s1358_s11 }
 0x3db   :  { %s1610_s24 = scalar_lea.vmem %s1359_s11, 64  ;;  %p1615_p3 = scmp.lt.s32.totalorder %s1359_s11, %s1359_s11 }
 0x3dc   :  { %p1611_p2 = scmp.ne.s32.totalorder %s1359_s11, %s1610_s24  ;;  %p1616_p4 = scmp.lt.s32.totalorder %s1610_s24, %s1610_s24 }
 0x3de   :  { %p1617_p5 = por %p1616_p4, %p1615_p3 }
 0x3e0   :  { %p1618_p6 = pnand %p1617_p5, %p1611_p2 }
 0x3e2   :  { %1621 = shalt.err (!%p1618_p6)
}
 0x3e3   :  { %s1622_s25 = scalar_lea.hbm %s1982_s14, 64 }
 0x3e4   :  { %p1623_p7 = scmp.ne.s32.totalorder %s1982_s14, %s1622_s25  ;;  %p1626_p8 = scmp.lt.u32.totalorder %s1622_s25, %s1982_s14 }
 0x3e6   :  { %p1628_p9 = pnand %p1626_p8, %p1623_p7 }
 0x3e8   :  { %1631 = shalt.err (!%p1628_p9)
}
 0x3e9   :  { %1361 = dma.vmem_to_hbm [thread:$0]  %s1359_s11, 64, %s1982_s14, [#allocation8]   ;;  %vm1255_vm5 = vcmask 24576  }
 0x3ea   :  { %s1669_s8 = smov [#allocation6]  }
 0x3eb   :  { %s1338_s10 = sshll.u32 %s1669_s8, 4  ;;  %s1339_s10 = int_to_ptr.vmem [resolvable:$true] %s1338_s10 }
 0x3ec   :  { %s1632_s29 = scalar_lea.vmem %s1339_s10, 32  ;;  %p1637_p11 = scmp.lt.s32.totalorder %s1339_s10, %s1339_s10 }
 0x3ed   :  { %p1633_p10 = scmp.ne.s32.totalorder %s1339_s10, %s1632_s29  ;;  %p1638_p12 = scmp.lt.s32.totalorder %s1632_s29, %s1632_s29 }
 0x3ef   :  { %p1639_p13 = por %p1638_p12, %p1637_p11 }
 0x3f1   :  { %p1640_p0 = pnand %p1639_p13, %p1633_p10 }
 0x498   :  { %v1327_v5 = vpop.f32.mrb[12].mxu1 }
 0x499   :  { %1331 = vst.msk [vmem:[#allocation6 + $0x1] sm:$0x1] %vm1255_vm5, %v1327_v5  ;;  %v1329_v32 = vpop.f32.mrb[13].mxu1 }
 0x49a   :  { %v1251_v2 = vpop.f32.mrb[12].mxu0 }
 0x49b   :  { %1256 = vst.msk [vmem:[#allocation6] sm:$0x1] %vm1255_vm5, %v1251_v2  ;;  %v1253_v36 = vpop.f32.mrb[13].mxu0 }
 0x49c   :  { %1643 = shalt.err (!%p1640_p0)
}
 0x49d   :  { %s1644_s14 = scalar_lea.hbm %s1980_s12, 32 }
 0x49e   :  { %p1645_p1 = scmp.ne.s32.totalorder %s1980_s12, %s1644_s14  ;;  %p1648_p2 = scmp.lt.u32.totalorder %s1644_s14, %s1980_s12 }
 0x4a0   :  { %p1650_p3 = pnand %p1648_p2, %p1645_p1 }
 0x4a2   :  { %1653 = shalt.err (!%p1650_p3)
}
 0x4a3   :  { %1341 = dma.vmem_to_hbm [thread:$0]  %s1339_s10, 32, %s1980_s12, [#allocation5]  }
 0x4a4   :  { %1656 = dma.done.wait [#allocation5], 32  }
 0x4a5   :  { %1657 = vsyncadd [#allocation5], 4294967264 }
 0x4a6   :  { %1658 = dma.done.wait [#allocation8], 128  }
 0x4a7   :  { %1659 = vsyncadd [#allocation8], 4294967168 }
 0x4a8   :  { %1371 = vsyncpa [#allocation4], 1 }
 0x4a9   :  { %1372 = vsyncpa [#allocation5], 1 }
 0x4aa   :  { %1373 = vsyncpa [#allocation8], 1 }

</bundles_post_ra>
